<compile_context>
chip_gen: v5e
topology: v5e:2x2
jax: 0.10.0
libtpu: 0.0.40
codegen_flags: <defaults>
</compile_context>

<pallas_src>
import functools

import jax
import jax.numpy as jnp
from jax.experimental import pallas as pl
from jax.experimental.pallas import tpu as pltpu


def _tv_partial_kernel(x_ref, out_ref, *, H, W):
    """One grid step: partial h_tv / w_tv sums for a (TBC, H, W) block.

    x_ref   : (TBC, H, W) VMEM tile of the collapsed image stack.
    out_ref : (1, 8, 128) f32 VMEM tile; sublane 0 carries the h_tv partial,
              sublane 1 the w_tv partial (lane-dense, unmasked store).
    """
    x = x_ref[...]

    # Vertical (H) first differences; square-accumulate in f32.
    dh = (x[:, 1:, :] - x[:, : H - 1, :]).astype(jnp.float32)
    h_tv = jnp.sum(dh * dh)

    # Horizontal (W) first differences; square-accumulate in f32.
    dw = (x[:, :, 1:] - x[:, :, : W - 1]).astype(jnp.float32)
    w_tv = jnp.sum(dw * dw)

    sub = jax.lax.broadcasted_iota(jnp.int32, out_ref.shape, 1)
    out_ref[...] = jnp.where(sub == 0, h_tv, jnp.where(sub == 1, w_tv, 0.0))


def _pick_block_bc(bc, h, w, itemsize, budget_bytes=2 * 1024 * 1024):
    """Largest divisor of bc whose (tbc, H, W) tile stays under the byte budget."""
    per_image = h * w * itemsize
    max_tbc = max(1, budget_bytes // per_image)
    tbc = 1
    for d in range(1, bc + 1):
        if bc % d == 0 and d <= max_tbc:
            tbc = d
    return tbc


def tv_loss(x, tv_loss_weight=1.0):
    """Pallas implementation of TVLoss.forward(x). x: (B, C, H, W)."""
    assert x.ndim == 4, "expected NCHW input"
    B, C, H, W = x.shape
    bc = B * C
    x2 = x.reshape(bc, H, W)  # pure reshape, no data movement

    tbc = _pick_block_bc(bc, H, W, x.dtype.itemsize)
    num_blocks = bc // tbc

    # VMEM budget: double-buffered input tile + f32 diff temporaries + margin,
    # clamped so it is safe on every TPU generation (v5e/v6e/v7x).
    tile_in_bytes = tbc * H * W * x.dtype.itemsize
    tile_f32_bytes = tbc * H * W * 4
    vmem_limit = int(
        min(48 * 2**20, max(16 * 2**20, 4 * tile_in_bytes + 6 * tile_f32_bytes))
    )

    n_elems = bc * H * W
    cost = pl.CostEstimate(
        flops=8 * n_elems,
        transcendentals=0,
        bytes_accessed=n_elems * x.dtype.itemsize + num_blocks * 8 * 128 * 4,
    )

    kernel = functools.partial(_tv_partial_kernel, H=H, W=W)

    partials = pl.pallas_call(
        kernel,
        out_shape=jax.ShapeDtypeStruct((num_blocks, 8, 128), jnp.float32),
        grid=(num_blocks,),
        in_specs=[pl.BlockSpec((tbc, H, W), lambda i: (i, 0, 0))],
        out_specs=pl.BlockSpec((1, 8, 128), lambda i: (i, 0, 0)),
        compiler_params=pltpu.CompilerParams(
            dimension_semantics=("parallel",),
            vmem_limit_bytes=vmem_limit,
        ),
        cost_estimate=cost,
    )(x2)

    h_tv = jnp.sum(partials[:, 0, 0])
    w_tv = jnp.sum(partials[:, 1, 0])

    # Fold all constant scale factors into two python-float multipliers.
    # NOTE: H == 1 or W == 1 gives count == 0; emit nan to mirror torch's 0/0.
    count_h = C * (H - 1) * W
    count_w = C * H * (W - 1)
    scale_h = (2.0 * float(tv_loss_weight) / (count_h * B)) if count_h > 0 else float("nan")
    scale_w = (2.0 * float(tv_loss_weight) / (count_w * B)) if count_w > 0 else float("nan")
    return scale_h * h_tv + scale_w * w_tv


def _reference(x, tv_loss_weight=1.0):
    """Pure-JAX reference mirroring the PyTorch TVLoss module."""
    B, C, H, W = x.shape
    count_h = C * (H - 1) * W
    count_w = C * H * (W - 1)
    h_tv = jnp.sum((x[:, :, 1:, :] - x[:, :, : H - 1, :]) ** 2)
    w_tv = jnp.sum((x[:, :, :, 1:] - x[:, :, :, : W - 1]) ** 2)
    return tv_loss_weight * 2.0 * (h_tv / count_h + w_tv / count_w) / B


if __name__ == "__main__":
    key = jax.random.PRNGKey(0)
    B, C, H, W = 2, 4, 16, 16
    x = jax.random.normal(key, (B, C, H, W), dtype=jnp.float32)

    loss = tv_loss(x, tv_loss_weight=1.0)
    jax.block_until_ready(loss)

    ref = _reference(x, tv_loss_weight=1.0)
    assert jnp.allclose(loss, ref, rtol=1e-5, atol=1e-5), (loss, ref)

    print("KERNEL_OK")
</pallas_src>

<mosaic_0001>
module attributes {stable_mosaic.version = 11 : i64} {
  func.func @_tv_partial_kernel(%arg0: i32, %arg1: memref<8x16x16xf32, #tpu.memory_space<vmem>>, %arg2: memref<1x8x128xf32, #tpu.memory_space<vmem>>) attributes {dimension_semantics = [#tpu.dimension_semantics<parallel>], iteration_bounds = array<i64: 1>, scalar_prefetch = 0 : i64, scratch_operands = 0 : i64, tpu.core_type = #tpu.core_type<tc>, window_params = [{transform_indices = @transform_0, window_bounds = array<i64: 8, 16, 16>}, {transform_indices = @transform_1, window_bounds = array<i64: 1, 8, 128>}]} {
    %c0 = arith.constant 0 : index
    %c0_0 = arith.constant 0 : index
    %c0_1 = arith.constant 0 : index
    %0 = vector.load %arg1[%c0, %c0_0, %c0_1] : memref<8x16x16xf32, #tpu.memory_space<vmem>>, vector<8x16x16xf32>
    %1 = vector.extract_strided_slice %0 {offsets = [0, 1, 0], sizes = [8, 15, 16], strides = [1, 1, 1]} : vector<8x16x16xf32> to vector<8x15x16xf32>
    %2 = vector.extract_strided_slice %0 {offsets = [0, 0, 0], sizes = [8, 15, 16], strides = [1, 1, 1]} : vector<8x16x16xf32> to vector<8x15x16xf32>
    %3 = arith.subf %1, %2 : vector<8x15x16xf32>
    %4 = arith.mulf %3, %3 : vector<8x15x16xf32>
    %5 = vector.shape_cast %4 : vector<8x15x16xf32> to vector<1x8x15x16xf32>
    %cst = arith.constant dense<0.000000e+00> : vector<1xf32>
    %6 = vector.multi_reduction <add>, %5, %cst [1, 2, 3] : vector<1x8x15x16xf32> to vector<1xf32>
    %7 = vector.shape_cast %6 : vector<1xf32> to vector<1x1x1x1xf32>
    %8 = vector.extract %7[0, 0, 0, 0] : f32 from vector<1x1x1x1xf32>
    %9 = vector.extract_strided_slice %0 {offsets = [0, 0, 1], sizes = [8, 16, 15], strides = [1, 1, 1]} : vector<8x16x16xf32> to vector<8x16x15xf32>
    %10 = vector.extract_strided_slice %0 {offsets = [0, 0, 0], sizes = [8, 16, 15], strides = [1, 1, 1]} : vector<8x16x16xf32> to vector<8x16x15xf32>
    %11 = arith.subf %9, %10 : vector<8x16x15xf32>
    %12 = arith.mulf %11, %11 : vector<8x16x15xf32>
    %13 = vector.shape_cast %12 : vector<8x16x15xf32> to vector<1x8x16x15xf32>
    %cst_2 = arith.constant dense<0.000000e+00> : vector<1xf32>
    %14 = vector.multi_reduction <add>, %13, %cst_2 [1, 2, 3] : vector<1x8x16x15xf32> to vector<1xf32>
    %15 = vector.shape_cast %14 : vector<1xf32> to vector<1x1x1x1xf32>
    %16 = vector.extract %15[0, 0, 0, 0] : f32 from vector<1x1x1x1xf32>
    %17 = tpu.iota {dimensions = array<i32: 1>} : vector<1x8x128xi32>
    %c0_i32 = arith.constant 0 : i32
    %18 = vector.broadcast %c0_i32 : i32 to vector<1x8x128xi32>
    %19 = arith.cmpi eq, %17, %18 : vector<1x8x128xi32>
    %c1_i32 = arith.constant 1 : i32
    %20 = vector.broadcast %c1_i32 : i32 to vector<1x8x128xi32>
    %21 = arith.cmpi eq, %17, %20 : vector<1x8x128xi32>
    %cst_3 = arith.constant 0.000000e+00 : f32
    %22 = vector.broadcast %16 : f32 to vector<1x8x128xf32>
    %23 = vector.broadcast %cst_3 : f32 to vector<1x8x128xf32>
    %24 = arith.select %21, %22, %23 : vector<1x8x128xi1>, vector<1x8x128xf32>
    %25 = vector.broadcast %8 : f32 to vector<1x8x128xf32>
    %26 = arith.select %19, %25, %24 : vector<1x8x128xi1>, vector<1x8x128xf32>
    %c0_4 = arith.constant 0 : index
    %c0_5 = arith.constant 0 : index
    %c0_6 = arith.constant 0 : index
    %27 = vector.load %arg2[%c0_4, %c0_5, %c0_6] : memref<1x8x128xf32, #tpu.memory_space<vmem>>, vector<1x8x128xf32>
    tpu.vector_store %arg2[%c0_4, %c0_5, %c0_6], %26 {strides = array<i32>} : memref<1x8x128xf32, #tpu.memory_space<vmem>>, vector<1x8x128xf32>,
    return
  }
  func.func @transform_0(%arg0: i32) -> (i32, i32, i32) {
    %c0_i32 = arith.constant 0 : i32
    %c0_i32_0 = arith.constant 0 : i32
    %c0_i32_1 = arith.constant 0 : i32
    return %arg0, %c0_i32, %c0_i32_0 : i32, i32, i32
  }
  func.func @transform_1(%arg0: i32) -> (i32, i32, i32) {
    %c0_i32 = arith.constant 0 : i32
    %c0_i32_0 = arith.constant 0 : i32
    %c0_i32_1 = arith.constant 0 : i32
    return %arg0, %c0_i32, %c0_i32_0 : i32, i32, i32
  }
}

</mosaic_0001>

<bundles_post_ra>
// kernel: tpu_custom_call.1
= control target key start
LH: loop header
LB: loop body
LE: loop exit
PB: predicated region body
PF: predicated region fallthrough
CT: control target
= control target key end

     0   :  { %6 = vsyncpa [#allocation3], 0  ;;  %s684_s0 = inlined_call_operand.hbm [shape: f32[8,16,16], index: 0, kind: input, shape index: {}]   ;;  %s685_s1 = inlined_call_operand.hbm [shape: f32[1,8,128], index: 1, kind: output, shape index: {}]  }
   0x1   :  { %7 = vsyncpa [#allocation4], 0  ;;  %s12_s8 = sshll.u32 %s684_s0, 4  ;;  %s502_s9 = smov [#allocation2]   ;;  %s13_s8 = int_to_ptr.hbm [resolvable:$true] %s12_s8 }
   0x2   :  { %s14_s10 = sshll.u32 %s502_s9, 4  ;;  %s503_s11 = smov 128   ;;  %s15_s10 = int_to_ptr.vmem [resolvable:$true] %s14_s10 }
   0x3   :  { %s504_s12 = smov 8  }
   0x4   :  { %20 = dma.hbm_to_vmem [thread:$0]  %s13_s8, 2048, %s15_s10, [#allocation3], %s503_s11, %s503_s11, %s504_s12  }
   0x5   :  { %498 = dma.done.wait [#allocation3], 2048  }
   0x6   :  { %499 = vsyncadd [#allocation3], 4294965248  ;;  %v521_v0 = vld [vmem:[#allocation2 + $0x10] sm:$0xff]  ;;  %v523_v1 = vld [vmem:[#allocation2] sm:$0xff]  ;;  %s505_s13 = smov 1   ;;  %s506_s0 = smov 127  }
   0x7   :  { %233 = vrot.lane.b32.xlu1 %v521_v0, %s505_s13  ;;  %229 = vrot.lane.b32.xlu0 %v523_v1, %s505_s13  ;;  %v527_v2 = vld [vmem:[#allocation2 + $0x20] sm:$0xff]  ;;  %v530_v3 = vld [vmem:[#allocation2 + $0x18] sm:$0xff]  ;;  %v532_v4 = vld [vmem:[#allocation2 + $0x8] sm:$0xff]  ;;  %vm57_vm0 = vcmask 1040384   ;;  %vm146_vm1 = vcmask 1046528   ;;  %vm187_vm2 = vcmask 130048  }
   0x8   :  { %237 = vrot.lane.b32.xlu2 %v527_v2, %s505_s13  ;;  %v534_v5 = vld [vmem:[#allocation2 + $0x28] sm:$0xff]  ;;  %v539_v6 = vld [vmem:[#allocation2 + $0x30] sm:$0xff]  ;;  %v541_v7 = vld [vmem:[#allocation2 + $0x38] sm:$0xff]  ;;  %vm189_vm3 = vcmask 129024   ;;  %vm373_vm4 = vcmask 121856   ;;  %s507_s14 = smov [#allocation5]  }
   0x9   :  { %v543_v8 = vld [vmem:[#allocation2 + $0x40] sm:$0xff]  ;;  %v548_v9 = vld [vmem:[#allocation2 + $0x48] sm:$0xff]  ;;  %v550_v10 = vld [vmem:[#allocation2 + $0x50] sm:$0xff]  ;;  %s428_s15 = sshll.u32 %s507_s14, 4  ;;  %s430_s19 = sshll.u32 %s685_s1, 4  ;;  %s429_s15 = int_to_ptr.vmem [resolvable:$true] %s428_s15  ;;  %s431_s19 = int_to_ptr.hbm [resolvable:$true] %s430_s19 }
   0xa   :  { %v552_v11 = vld [vmem:[#allocation2 + $0x58] sm:$0xff]  ;;  %v557_v12 = vld [vmem:[#allocation2 + $0x60] sm:$0xff]  ;;  %v559_v13 = vld [vmem:[#allocation2 + $0x68] sm:$0xff] }
   0xb   :  { %v561_v14 = vld [vmem:[#allocation2 + $0x70] sm:$0xff]  ;;  %v566_v15 = vld [vmem:[#allocation2 + $0x78] sm:$0xff] }
   0xf   :  { %235 = vrot.lane.b32.xlu1 %v530_v3, %s505_s13  ;;  %231 = vrot.lane.b32.xlu0 %v532_v4, %s505_s13 }
  0x10   :  { %239 = vrot.lane.b32.xlu2 %v534_v5, %s505_s13 }
  0x17   :  { %241 = vrot.lane.b32.xlu0 %v539_v6, %s505_s13  ;;  %243 = vrot.lane.b32.xlu1 %v541_v7, %s505_s13 }
  0x18   :  { %245 = vrot.lane.b32.xlu2 %v543_v8, %s505_s13 }
  0x1f   :  { %247 = vrot.lane.b32.xlu0 %v548_v9, %s505_s13  ;;  %249 = vrot.lane.b32.xlu1 %v550_v10, %s505_s13 }
  0x20   :  { %251 = vrot.lane.b32.xlu2 %v552_v11, %s505_s13 }
  0x27   :  { %253 = vrot.lane.b32.xlu0 %v557_v12, %s505_s13  ;;  %255 = vrot.lane.b32.xlu1 %v559_v13, %s505_s13 }
  0x28   :  { %257 = vrot.lane.b32.xlu2 %v561_v14, %s505_s13 }
  0x2f   :  { %259 = vrot.lane.b32.xlu0 %v566_v15, %s505_s13 }
  0x62   :  { %v238_v16 = vpop.permute.xlu2 %237 }
  0x63   :  { %v281_v34 = vsub.f32 %v527_v2, %v238_v16  ;;  %v58_v16 = vrot.slane %v523_v1, 7 }
  0x65   :  { %v297_v40 = vmul.f32 %v281_v34, %v281_v34 }
  0x6a   :  { %v240_v17 = vpop.permute.xlu2 %239 }
  0x6b   :  { %v282_v24 = vsub.f32 %v534_v5, %v240_v17  ;;  %v59_v17 = vrot.slane %v532_v4, 7 }
  0x6d   :  { %v298_v30 = vmul.f32 %v282_v24, %v282_v24 }
  0x72   :  { %v246_v25 = vpop.permute.xlu2 %245 }
  0x73   :  { %v285_v33 = vsub.f32 %v543_v8, %v246_v25 }
  0x75   :  { %v301_v39 = vmul.f32 %v285_v33, %v285_v33 }
  0x79   :  { %v234_v18 = vpop.permute.xlu1 %233  ;;  %v230_v19 = vpop.permute.xlu0 %229 }
  0x7a   :  { %v279_v20 = vsub.f32 %v521_v0, %v234_v18  ;;  %v277_v21 = vsub.f32 %v523_v1, %v230_v19  ;;  %v252_v38 = vpop.permute.xlu2 %251  ;;  %v61_v18 = vrot.slane %v521_v0, 7  ;;  %v62_v19 = vrot.slane %v530_v3, 7 }
  0x7b   :  { %v288_v43 = vsub.f32 %v552_v11, %v252_v38 }
  0x7c   :  { %v295_v22 = vmul.f32 %v279_v20, %v279_v20  ;;  %v293_v23 = vmul.f32 %v277_v21, %v277_v21  ;;  %v60_v20 = vsel %vm57_vm0, %v58_v16, %v59_v17  ;;  %v98_v21 = vsub.f32 %v523_v1, %v58_v16 }
  0x7d   :  { %v304_v48 = vmul.f32 %v288_v43, %v288_v43  ;;  %v100_v24 = vsub.f32 %v521_v0, %v61_v18 }
  0x7e   :  { %329 = vrot.lane.b32.xlu0 %v295_v22, %s506_s0  ;;  %325 = vrot.lane.b32.xlu1 %v293_v23, %s506_s0  ;;  %v99_v22 = vsub.f32 %v532_v4, %v60_v20  ;;  %v63_v23 = vsel %vm57_vm0, %v61_v18, %v62_v19  ;;  %v114_v25 = vmul.f32 %v98_v21, %v98_v21 }
  0x81   :  { %v236_v26 = vpop.permute.xlu1 %235  ;;  %v232_v27 = vpop.permute.xlu0 %231 }
  0x82   :  { %v280_v28 = vsub.f32 %v530_v3, %v236_v26  ;;  %v278_v29 = vsub.f32 %v532_v4, %v232_v27  ;;  %v258_v50 = vpop.permute.xlu2 %257  ;;  %v101_v26 = vsub.f32 %v530_v3, %v63_v23  ;;  %v115_v27 = vmul.f32 %v99_v22, %v99_v22 }
  0x83   :  { %v291_v52 = vsub.f32 %v561_v14, %v258_v50 }
  0x84   :  { %v296_v31 = vmul.f32 %v280_v28, %v280_v28  ;;  %v294_v32 = vmul.f32 %v278_v29, %v278_v29  ;;  %v64_v28 = vrot.slane %v527_v2, 7  ;;  %v65_v29 = vrot.slane %v534_v5, 7 }
  0x85   :  { %v307_v56 = vmul.f32 %v291_v52, %v291_v52  ;;  %v148_v33 = vrot.slane %v115_v27, 1 }
  0x86   :  { %331 = vrot.lane.b32.xlu1 %v296_v31, %s506_s0  ;;  %327 = vrot.lane.b32.xlu2 %v294_v32, %s506_s0  ;;  %v147_v31 = vrot.slane %v114_v25, 1  ;;  %v117_v32 = vmul.f32 %v101_v26, %v101_v26  ;;  %v66_v1 = vsel %vm57_vm0, %v64_v28, %v65_v29  ;;  %v102_v4 = vsub.f32 %v527_v2, %v64_v28 }
  0x87   :  { %335 = vrot.lane.b32.xlu0 %v298_v30, %s506_s0  ;;  %v116_v30 = vmul.f32 %v100_v24, %v100_v24  ;;  %v76_v24 = vrot.slane %v557_v12, 7  ;;  %v77_v25 = vrot.slane %v559_v13, 7 }
  0x88   :  { %v151_v34 = vrot.slane %v117_v32, 1  ;;  %v149_v3 = vsel %vm146_vm1, %v147_v31, %v148_v33 }
  0x89   :  { %v242_v35 = vpop.permute.xlu0 %241  ;;  %v244_v36 = vpop.permute.xlu1 %243  ;;  %v150_v0 = vrot.slane %v116_v30, 1  ;;  %v188_v38 = vsel %vm187_vm2, %v149_v3, 0.0  ;;  %v78_v31 = vsel %vm57_vm0, %v76_v24, %v77_v25  ;;  %v110_v32 = vsub.f32 %v557_v12, %v76_v24 }
  0x8a   :  { %v283_v37 = vsub.f32 %v539_v6, %v242_v35  ;;  %v284_v42 = vsub.f32 %v541_v7, %v244_v36  ;;  %v103_v35 = vsub.f32 %v534_v5, %v66_v1  ;;  %v67_v36 = vrot.slane %v539_v6, 7 }
  0x8c   :  { %v299_v41 = vmul.f32 %v283_v37, %v283_v37  ;;  %v300_v47 = vmul.f32 %v284_v42, %v284_v42  ;;  %v68_v37 = vrot.slane %v541_v7, 7  ;;  %v119_v42 = vmul.f32 %v103_v35, %v103_v35 }
  0x8e   :  { %333 = vrot.lane.b32.xlu2 %v297_v40, %s506_s0  ;;  %337 = vrot.lane.b32.xlu1 %v299_v41, %s506_s0  ;;  %v152_v40 = vsel %vm146_vm1, %v150_v0, %v151_v34  ;;  %v118_v41 = vmul.f32 %v102_v4, %v102_v4  ;;  %v69_v2 = vsel %vm57_vm0, %v67_v36, %v68_v37 }
  0x8f   :  { %341 = vrot.lane.b32.xlu0 %v301_v39, %s506_s0  ;;  %v190_v39 = vsel %vm189_vm3, %v148_v33, 0.0  ;;  %v111_v0 = vsub.f32 %v559_v13, %v78_v31 }
  0x90   :  { %v191_v43 = vadd.f32 %v190_v39, %v188_v38  ;;  %v153_v5 = vrot.slane %v118_v41, 1 }
  0x91   :  { %v248_v44 = vpop.permute.xlu0 %247  ;;  %v250_v45 = vpop.permute.xlu1 %249  ;;  %v127_v38 = vmul.f32 %v111_v0, %v111_v0 }
  0x92   :  { %v286_v46 = vsub.f32 %v548_v9, %v248_v44  ;;  %v287_v51 = vsub.f32 %v550_v10, %v250_v45  ;;  %v192_v44 = vsel %vm187_vm2, %v152_v40, 0.0  ;;  %v104_v45 = vsub.f32 %v539_v6, %v67_v36 }
  0x93   :  { %v193_v50 = vadd.f32 %v192_v44, %v191_v43  ;;  %v80_v36 = vrot.slane %v566_v15, 7  ;;  %v166_v44 = vrot.slane %v127_v38, 1 }
  0x94   :  { %v302_v49 = vmul.f32 %v286_v46, %v286_v46  ;;  %v303_v55 = vmul.f32 %v287_v51, %v287_v51  ;;  %v154_v46 = vrot.slane %v119_v42, 1  ;;  %v194_v51 = vsel %vm189_vm3, %v151_v34, 0.0 }
  0x95   :  { %v120_v52 = vmul.f32 %v104_v45, %v104_v45  ;;  %v126_v34 = vmul.f32 %v110_v32, %v110_v32 }
  0x96   :  { %343 = vrot.lane.b32.xlu1 %v302_v49, %s506_s0  ;;  %339 = vrot.lane.b32.xlu2 %v300_v47, %s506_s0  ;;  %v105_v47 = vsub.f32 %v541_v7, %v69_v2  ;;  %v70_v49 = vrot.slane %v543_v8, 7 }
  0x97   :  { %347 = vrot.lane.b32.xlu0 %v304_v48, %s506_s0  ;;  %v71_v48 = vrot.slane %v548_v9, 7  ;;  %v165_v39 = vrot.slane %v126_v34, 1 }
  0x98   :  { %v106_v7 = vsub.f32 %v543_v8, %v70_v49 }
  0x99   :  { %v254_v53 = vpop.permute.xlu0 %253  ;;  %v256_v57 = vpop.permute.xlu1 %255 }
  0x9a   :  { %v289_v54 = vsub.f32 %v557_v12, %v254_v53  ;;  %v290_v59 = vsub.f32 %v559_v13, %v256_v57  ;;  %v155_v53 = vsel %vm146_vm1, %v153_v5, %v154_v46  ;;  %v156_v57 = vrot.slane %v120_v52, 1 }
  0x9b   :  { %v196_v6 = vsel %vm187_vm2, %v155_v53, 0.0  ;;  %v122_v17 = vmul.f32 %v106_v7, %v106_v7  ;;  %v214_v52 = vsel %vm189_vm3, %v166_v44, 0.0 }
  0x9c   :  { %v305_v58 = vmul.f32 %v289_v54, %v289_v54  ;;  %v306_v62 = vmul.f32 %v290_v59, %v290_v59  ;;  %v121_v54 = vmul.f32 %v105_v47, %v105_v47  ;;  %v167_v47 = vsel %vm146_vm1, %v165_v39, %v166_v44 }
  0x9d   :  { %v159_v22 = vrot.slane %v122_v17, 1 }
  0x9e   :  { %349 = vrot.lane.b32.xlu1 %v305_v58, %s506_s0  ;;  %345 = vrot.lane.b32.xlu2 %v303_v55, %s506_s0  ;;  %v72_v55 = vsel %vm57_vm0, %v70_v49, %v71_v48  ;;  %v157_v58 = vrot.slane %v121_v54, 1  ;;  %v212_v49 = vsel %vm187_vm2, %v167_v47, 0.0 }
  0x9f   :  { %353 = vrot.lane.b32.xlu0 %v307_v56, %s506_s0  ;;  %v195_v56 = vadd.f32 %v194_v51, %v193_v50  ;;  %v107_v59 = vsub.f32 %v548_v9, %v72_v55 }
  0xa0   :  { %v158_v16 = vsel %vm146_vm1, %v156_v57, %v157_v58  ;;  %v202_v27 = vsel %vm189_vm3, %v157_v58, 0.0 }
  0xa1   :  { %v260_v60 = vpop.permute.xlu0 %259  ;;  %v123_v18 = vmul.f32 %v107_v59, %v107_v59  ;;  %v200_v21 = vsel %vm187_vm2, %v158_v16, 0.0 }
  0xa2   :  { %v292_v61 = vsub.f32 %v566_v15, %v260_v60  ;;  %v73_v60 = vrot.slane %v550_v10, 7 }
  0xa3   :  { %v160_v8 = vrot.slane %v123_v18, 1 }
  0xa4   :  { %v308_v63 = vmul.f32 %v292_v61, %v292_v61  ;;  %v74_v61 = vrot.slane %v552_v11, 7  ;;  %v108_v9 = vsub.f32 %v550_v10, %v73_v60  ;;  %v79_v10 = vrot.slane %v561_v14, 7 }
  0xa5   :  { %v161_v28 = vsel %vm146_vm1, %v159_v22, %v160_v8  ;;  %v206_v12 = vsel %vm189_vm3, %v160_v8, 0.0 }
  0xa6   :  { %355 = vrot.lane.b32.xlu1 %v308_v63, %s506_s0  ;;  %351 = vrot.lane.b32.xlu2 %v306_v62, %s506_s0  ;;  %v197_v62 = vadd.f32 %v196_v6, %v195_v56  ;;  %v198_v63 = vsel %vm189_vm3, %v154_v46, 0.0  ;;  %v75_v19 = vsel %vm57_vm0, %v73_v60, %v74_v61  ;;  %v124_v29 = vmul.f32 %v108_v9, %v108_v9 }
  0xa7   :  { %v109_v23 = vsub.f32 %v552_v11, %v75_v19  ;;  %v204_v11 = vsel %vm187_vm2, %v161_v28, 0.0  ;;  %v112_v35 = vsub.f32 %v561_v14, %v79_v10  ;;  %v81_v2 = vsel %vm57_vm0, %v79_v10, %v80_v36 }
  0xa8   :  { %v199_v20 = vadd.f32 %v198_v63, %v197_v62  ;;  %v162_v1 = vrot.slane %v124_v29, 1  ;;  %v113_v13 = vsub.f32 %v566_v15, %v81_v2 }
  0xa9   :  { %v125_v30 = vmul.f32 %v109_v23, %v109_v23  ;;  %v128_v40 = vmul.f32 %v112_v35, %v112_v35 }
  0xaa   :  { %v201_v26 = vadd.f32 %v200_v21, %v199_v20  ;;  %v129_v46 = vmul.f32 %v113_v13, %v113_v13 }
  0xab   :  { %v163_v4 = vrot.slane %v125_v30, 1  ;;  %v168_v5 = vrot.slane %v128_v40, 1 }
  0xac   :  { %v203_v33 = vadd.f32 %v202_v27, %v201_v26  ;;  %v169_v50 = vrot.slane %v129_v46, 1 }
  0xad   :  { %v164_v37 = vsel %vm146_vm1, %v162_v1, %v163_v4  ;;  %v210_v14 = vsel %vm189_vm3, %v163_v4, 0.0 }
  0xae   :  { %v205_v3 = vadd.f32 %v204_v11, %v203_v33  ;;  %v208_v43 = vsel %vm187_vm2, %v164_v37, 0.0  ;;  %v170_v54 = vsel %vm146_vm1, %v168_v5, %v169_v50  ;;  %v218_v59 = vsel %vm189_vm3, %v169_v50, 0.0 }
  0xaf   :  { %v216_v6 = vsel %vm187_vm2, %v170_v54, 0.0 }
  0xb0   :  { %v207_v42 = vadd.f32 %v206_v12, %v205_v3 }
  0xb2   :  { %v209_v45 = vadd.f32 %v208_v43, %v207_v42 }
  0xb4   :  { %v211_v48 = vadd.f32 %v210_v14, %v209_v45 }
  0xb6   :  { %v213_v51 = vadd.f32 %v212_v49, %v211_v48 }
  0xb8   :  { %v215_v15 = vadd.f32 %v214_v52, %v213_v51 }
  0xba   :  { %v217_v58 = vadd.f32 %v216_v6, %v215_v15  ;;  %v414_v15 = vlaneseq }
  0xbc   :  { %v219_v61 = vadd.f32 %v218_v59, %v217_v58 }
  0xcf   :  { %220 = vadd.xlane.f32.xlu2 %v219_v61 }
  0xe0   :  { %v328_v41 = vpop.permute.xlu2 %327 }
  0xe1   :  { %v375_v7 = vsel %vm373_vm4, %v328_v41, 0.0 }
  0xe8   :  { %v334_v57 = vpop.permute.xlu2 %333 }
  0xe9   :  { %v381_v21 = vsel %vm373_vm4, %v334_v57, 0.0 }
  0xf0   :  { %v326_v53 = vpop.permute.xlu1 %325  ;;  %v330_v56 = vpop.permute.xlu0 %329 }
  0xf1   :  { %v374_v55 = vsel %vm373_vm4, %v326_v53, 0.0  ;;  %v377_v62 = vsel %vm373_vm4, %v330_v56, 0.0  ;;  %v340_v20 = vpop.permute.xlu2 %339 }
  0xf2   :  { %v376_v60 = vadd.f32 %v375_v7, %v374_v55  ;;  %v387_v25 = vsel %vm373_vm4, %v340_v20, 0.0  ;;  %v415_v55 = vshrl.u32 %v414_v15, 7 }
  0xf4   :  { %v378_v63 = vadd.f32 %v377_v62, %v376_v60  ;;  %vm417_vm5 = vcmp.eq.s32.totalorder %v415_v55, 1  ;;  %vm416_vm6 = vcmp.eq.s32.totalorder %v415_v55, 0 }
  0xf8   :  { %v332_v16 = vpop.permute.xlu1 %331 }
  0xf9   :  { %v379_v17 = vsel %vm373_vm4, %v332_v16, 0.0  ;;  %v336_v18 = vpop.permute.xlu0 %335  ;;  %v346_v29 = vpop.permute.xlu2 %345 }
  0xfa   :  { %v380_v19 = vadd.f32 %v379_v17, %v378_v63  ;;  %v383_v8 = vsel %vm373_vm4, %v336_v18, 0.0  ;;  %v393_v10 = vsel %vm373_vm4, %v346_v29, 0.0 }
  0xfc   :  { %v382_v22 = vadd.f32 %v381_v21, %v380_v19 }
  0xfe   :  { %v384_v9 = vadd.f32 %v383_v8, %v382_v22 }
 0x100   :  { %v338_v23 = vpop.permute.xlu1 %337 }
 0x101   :  { %v385_v24 = vsel %vm373_vm4, %v338_v23, 0.0  ;;  %v342_v26 = vpop.permute.xlu0 %341  ;;  %v352_v34 = vpop.permute.xlu2 %351 }
 0x102   :  { %v386_v27 = vadd.f32 %v385_v24, %v384_v9  ;;  %v389_v30 = vsel %vm373_vm4, %v342_v26, 0.0  ;;  %v399_v37 = vsel %vm373_vm4, %v352_v34, 0.0 }
 0x104   :  { %v388_v28 = vadd.f32 %v387_v25, %v386_v27 }
 0x106   :  { %v390_v31 = vadd.f32 %v389_v30, %v388_v28 }
 0x108   :  { %v344_v32 = vpop.permute.xlu1 %343 }
 0x109   :  { %v391_v33 = vsel %vm373_vm4, %v344_v32, 0.0  ;;  %v348_v11 = vpop.permute.xlu0 %347 }
 0x10a   :  { %v392_v1 = vadd.f32 %v391_v33, %v390_v31  ;;  %v395_v0 = vsel %vm373_vm4, %v348_v11, 0.0 }
 0x10c   :  { %v394_v4 = vadd.f32 %v393_v10, %v392_v1 }
 0x10e   :  { %v396_v3 = vadd.f32 %v395_v0, %v394_v4 }
 0x110   :  { %v350_v35 = vpop.permute.xlu1 %349 }
 0x111   :  { %v397_v36 = vsel %vm373_vm4, %v350_v35, 0.0  ;;  %v354_v12 = vpop.permute.xlu0 %353 }
 0x112   :  { %v398_v38 = vadd.f32 %v397_v36, %v396_v3  ;;  %v401_v40 = vsel %vm373_vm4, %v354_v12, 0.0 }
 0x114   :  { %v400_v39 = vadd.f32 %v399_v37, %v398_v38 }
 0x116   :  { %v402_v41 = vadd.f32 %v401_v40, %v400_v39 }
 0x118   :  { %v356_v42 = vpop.permute.xlu1 %355 }
 0x119   :  { %v403_v2 = vsel %vm373_vm4, %v356_v42, 0.0 }
 0x11a   :  { %v404_v43 = vadd.f32 %v403_v2, %v402_v41 }
 0x11c   :  { %405 = vadd.xlane.f32.xlu0 %v404_v43 }
 0x142   :  { %v221_v13 = vpop.xlane.xlu2 %220 }
 0x143   :  { %v222_v44 = vrot.slane %v221_v13, 4 }
 0x145   :  { %v223_v45 = vadd.f32 %v222_v44, %v221_v13 }
 0x147   :  { %v224_v14 = vrot.slane %v223_v45, 2 }
 0x149   :  { %v225_v5 = vadd.f32 %v224_v14, %v223_v45 }
 0x14b   :  { %v226_v46 = vrot.slane %v225_v5, 1 }
 0x14d   :  { %v227_v47 = vadd.f32 %v226_v46, %v225_v5 }
 0x14f   :  { %440 = vpush %v227_v47 }
 0x180   :  { %s441_s16 = spop %440 }
 0x181   :  { %v420_v6 = vstv %s441_s16 }
 0x18f   :  { %v406_v48 = vpop.xlane.xlu0 %405 }
 0x190   :  { %v407_v49 = vrot.slane %v406_v48, 4 }
 0x192   :  { %v408_v50 = vadd.f32 %v407_v49, %v406_v48 }
 0x194   :  { %v409_v51 = vrot.slane %v408_v50, 2 }
 0x196   :  { %v410_v52 = vadd.f32 %v409_v51, %v408_v50 }
 0x198   :  { %v411_v53 = vrot.slane %v410_v52, 1 }
 0x19a   :  { %v412_v54 = vadd.f32 %v411_v53, %v410_v52 }
 0x19c   :  { %442 = vpush %v412_v54 }
 0x1cd   :  { %s443_s20 = spop %442 }
 0x1ce   :  { %v418_v56 = vstv %s443_s20 }
 0x1cf   :  { %v419_v57 = vsel %vm417_vm5, %v418_v56, 0.0 }
 0x1d0   :  { %v421_v58 = vsel %vm416_vm6, %v420_v6, %v419_v57 }
 0x1d1   :  { %422 = vst [vmem:[#allocation5] sm:$0xff] %v421_v58 }
 0x1d2   :  { %433 = dma.vmem_to_hbm [thread:$0]  %s429_s15, 128, %s431_s19, [#allocation4]  }
 0x1d3   :  { %500 = dma.done.wait [#allocation4], 128  }
 0x1d4   :  { %501 = vsyncadd [#allocation4], 4294967168 }
 0x1d5   :  { %438 = vsyncpa [#allocation3], 1 }
 0x1d6   :  { %439 = vsyncpa [#allocation4], 1 }

</bundles_post_ra>
